<compile_context>
chip_gen: v5e
topology: v5e:2x2
jax: 0.10.0
libtpu: 0.0.40
codegen_flags: <defaults>
</compile_context>

<pallas_src>
import functools

import jax
import jax.numpy as jnp
from jax.experimental import pallas as pl
from jax.experimental.pallas import tpu as pltpu


def _round_up(n, m):
    return ((n + m - 1) // m) * m


def _fused_ensemble_mlp_kernel(x_ref, w1_ref, b1_ref, w2_ref, b2_ref, o_ref):
    # x_ref : (B_pad, D)       input, shared across all heads
    # w1_ref: (D, E*H)         all heads' layer-1 weights, ensemble on the lane axis
    # b1_ref: (1, E*H)         f32 biases
    # w2_ref: (E*H, EO_pad)    block-diagonal layer-2 weights, EO_pad = round_up(E*O, 128)
    # b2_ref: (1, EO_pad)      f32 biases (zero in padded lanes)
    # o_ref : (B_pad, EO_pad)  lane-dense output slab; head e at cols [e*O, (e+1)*O)
    w_dtype = w1_ref.dtype
    x = x_ref[...].astype(w_dtype)

    # Layer 1: one MXU matmul for all E heads; bias + ReLU in f32 on the VPU.
    h = jnp.dot(x, w1_ref[...], preferred_element_type=jnp.float32)
    h = jnp.maximum(h + b1_ref[...], 0.0)

    # Layer 2: block-diagonal matmul keeps heads independent; full-lane store.
    out = jnp.dot(h.astype(w_dtype), w2_ref[...], preferred_element_type=jnp.float32)
    o_ref[...] = (out + b2_ref[...]).astype(o_ref.dtype)


def pack_ensemble_params(w1, b1, w2, b2, compute_dtype=jnp.bfloat16):
    """One-time repack of per-head weights into fused, MXU-friendly operands.

    Call ONCE at parameter init (not per forward call).
    w1: (E, D, H)  b1: (E, H)  w2: (E, H, O)  b2: (E, O)
    Returns ((w1_cat, b1_cat, w2_bd, b2_bd), (E, D, H, O)).
    """
    E, D, H = w1.shape
    O = w2.shape[2]
    EH = E * H
    EO = E * O
    EO_pad = _round_up(EO, 128)

    # Layer 1: (E, D, H) -> (D, E*H); ensemble rides the lane axis.
    w1_cat = jnp.transpose(w1, (1, 0, 2)).reshape(D, EH).astype(compute_dtype)
    b1_cat = b1.reshape(1, EH).astype(jnp.float32)

    # Layer 2: tight block-diagonal (E*H, E*O), single pad to 128 lanes total.
    w2_bd = jnp.zeros((EH, EO_pad), dtype=compute_dtype)
    for e in range(E):  # E is tiny & static; scatter beats einsum-with-eye.
        w2_bd = w2_bd.at[e * H:(e + 1) * H, e * O:(e + 1) * O].set(
            w2[e].astype(compute_dtype))
    b2_bd = jnp.zeros((1, EO_pad), dtype=jnp.float32)
    b2_bd = b2_bd.at[0, :EO].set(b2.reshape(EO).astype(jnp.float32))

    return (w1_cat, b1_cat, w2_bd, b2_bd), (E, D, H, O)


@functools.partial(jax.jit, static_argnames=("E", "O"))
def _forward_packed(x, w1_cat, b1_cat, w2_bd, b2_bd, *, E, O):
    """Forward on pre-packed params.  x: (B, D) f32.  Returns (E, B, O) f32."""
    B, D = x.shape
    B_pad = _round_up(max(B, 8), 8)            # full sublanes -> unmasked vld/vst
    EO_pad = w2_bd.shape[1]

    x_pad = jnp.zeros((B_pad, D), x.dtype).at[:B].set(x)

    vmem = pl.BlockSpec(memory_space=pltpu.MemorySpace.VMEM)
    out_pad = pl.pallas_call(
        _fused_ensemble_mlp_kernel,
        out_shape=jax.ShapeDtypeStruct((B_pad, EO_pad), jnp.float32),
        in_specs=[vmem] * 5,       # no grid: one step, everything VMEM-resident
        out_specs=vmem,
    )(x_pad, w1_cat, b1_cat, w2_bd, b2_bd)

    # (B_pad, EO_pad) -> (E, B, O); padded rows/lanes are zero and sliced away.
    out = out_pad[:B, :E * O].reshape(B, E, O)
    return jnp.transpose(out, (1, 0, 2))


class EnsembledFeatureNetworkTPU:
    """JAX/Pallas equivalent of EnsembledFeatureNetwork.forward (extra_layer=False).

    The PyTorch module returns a list of per-head (B, O) tensors; here the heads
    are stacked as an (E, B, O) array (out[e] == net_list[e](x))."""

    def __init__(self, w1, b1, w2, b2, compute_dtype=jnp.bfloat16):
        (self.w1_cat, self.b1_cat, self.w2_bd, self.b2_bd), dims = \
            pack_ensemble_params(w1, b1, w2, b2, compute_dtype)
        self.E, self.D, self.H, self.O = dims

    def __call__(self, x):
        # x: (B, obs_dim) — the module flattens obs.image per sample first.
        x = x.reshape(x.shape[0], -1)
        return _forward_packed(x, self.w1_cat, self.b1_cat, self.w2_bd,
                               self.b2_bd, E=self.E, O=self.O)


def _reference(x, w1, b1, w2, b2):
    """Plain-JAX reference matching the PyTorch forward (per-head outputs)."""
    outs = []
    for e in range(w1.shape[0]):
        h = jnp.maximum(x @ w1[e] + b1[e], 0.0)
        outs.append(h @ w2[e] + b2[e])
    return outs


if __name__ == "__main__":
    # Small shapes consistent with the module:
    #   obs_space['image'][0] = obs_dim (flattened image feature per sample)
    B = 2      # batch
    D = 32     # obs_dim
    H = 64     # rnd_hidden_dim_size (default)
    O = 16     # output_embedding_size
    E = 5      # n_ensemble (default)

    key = jax.random.PRNGKey(0)
    kx, k1, k2, k3, k4 = jax.random.split(key, 5)

    x = jax.random.normal(kx, (B, D), dtype=jnp.float32)
    w1 = jax.random.uniform(k1, (E, D, H), minval=-0.1, maxval=0.1, dtype=jnp.float32)
    b1 = jax.random.uniform(k2, (E, H), minval=-0.1, maxval=0.1, dtype=jnp.float32)
    w2 = jax.random.uniform(k3, (E, H, O), minval=-0.1, maxval=0.1, dtype=jnp.float32)
    b2 = jax.random.uniform(k4, (E, O), minval=-0.1, maxval=0.1, dtype=jnp.float32)

    refs = _reference(x, w1, b1, w2, b2)

    # Exact-numerics path (f32 weights): tight tolerance vs. reference.
    net_f32 = EnsembledFeatureNetworkTPU(w1, b1, w2, b2, compute_dtype=jnp.float32)
    out_f32 = jax.block_until_ready(net_f32(x))
    assert out_f32.shape == (E, B, O)
    for e in range(E):
        assert jnp.allclose(out_f32[e], refs[e], atol=1e-5, rtol=1e-5)

    # Default perf path (bf16 weights, f32 accumulation): looser tolerance.
    net_bf16 = EnsembledFeatureNetworkTPU(w1, b1, w2, b2)
    out_bf16 = jax.block_until_ready(net_bf16(x))
    assert out_bf16.shape == (E, B, O)
    for e in range(E):
        assert jnp.allclose(out_bf16[e], refs[e], atol=5e-2, rtol=5e-2)

    print("KERNEL_OK")
</pallas_src>

<mosaic_0001>
module attributes {stable_mosaic.version = 11 : i64} {
  func.func @_fused_ensemble_mlp_kernel(%arg0: memref<8x32xf32, #tpu.memory_space<vmem>>, %arg1: memref<32x320xf32, #tpu.memory_space<vmem>>, %arg2: memref<1x320xf32, #tpu.memory_space<vmem>>, %arg3: memref<320x128xf32, #tpu.memory_space<vmem>>, %arg4: memref<1x128xf32, #tpu.memory_space<vmem>>, %arg5: memref<8x128xf32, #tpu.memory_space<vmem>>) attributes {dimension_semantics = [], scalar_prefetch = 0 : i64, scratch_operands = 0 : i64, tpu.core_type = #tpu.core_type<tc>} {
    %c0 = arith.constant 0 : index
    %c0_0 = arith.constant 0 : index
    %0 = vector.load %arg0[%c0, %c0_0] : memref<8x32xf32, #tpu.memory_space<vmem>>, vector<8x32xf32>
    %c0_1 = arith.constant 0 : index
    %c0_2 = arith.constant 0 : index
    %1 = vector.load %arg1[%c0_1, %c0_2] : memref<32x320xf32, #tpu.memory_space<vmem>>, vector<32x320xf32>
    %cst = arith.constant dense<0.000000e+00> : vector<8x320xf32>
    %2 = tpu.matmul %0, %1, %cst {dimension_numbers = #tpu.dot_dimension_numbers<[1], [0], [0], [1], [0, 0, 1, 1], [], []>} : vector<8x32xf32>, vector<32x320xf32>, vector<8x320xf32> -> vector<8x320xf32>
    %c0_3 = arith.constant 0 : index
    %c0_4 = arith.constant 0 : index
    %3 = vector.load %arg2[%c0_3, %c0_4] : memref<1x320xf32, #tpu.memory_space<vmem>>, vector<1x320xf32>
    %4 = vector.broadcast %3 : vector<1x320xf32> to vector<8x320xf32>
    %5 = arith.addf %2, %4 : vector<8x320xf32>
    %cst_5 = arith.constant 0.000000e+00 : f32
    %6 = vector.broadcast %cst_5 : f32 to vector<8x320xf32>
    %7 = arith.maximumf %5, %6 : vector<8x320xf32>
    %c0_6 = arith.constant 0 : index
    %c0_7 = arith.constant 0 : index
    %8 = vector.load %arg3[%c0_6, %c0_7] : memref<320x128xf32, #tpu.memory_space<vmem>>, vector<320x128xf32>
    %cst_8 = arith.constant dense<0.000000e+00> : vector<8x128xf32>
    %9 = tpu.matmul %7, %8, %cst_8 {dimension_numbers = #tpu.dot_dimension_numbers<[1], [0], [0], [1], [0, 0, 1, 1], [], []>} : vector<8x320xf32>, vector<320x128xf32>, vector<8x128xf32> -> vector<8x128xf32>
    %c0_9 = arith.constant 0 : index
    %c0_10 = arith.constant 0 : index
    %10 = vector.load %arg4[%c0_9, %c0_10] : memref<1x128xf32, #tpu.memory_space<vmem>>, vector<1x128xf32>
    %11 = vector.broadcast %10 : vector<1x128xf32> to vector<8x128xf32>
    %12 = arith.addf %9, %11 : vector<8x128xf32>
    %c0_11 = arith.constant 0 : index
    %c0_12 = arith.constant 0 : index
    %13 = vector.load %arg5[%c0_11, %c0_12] : memref<8x128xf32, #tpu.memory_space<vmem>>, vector<8x128xf32>
    tpu.vector_store %arg5[%c0_11, %c0_12], %12 {strides = array<i32>} : memref<8x128xf32, #tpu.memory_space<vmem>>, vector<8x128xf32>,
    return
  }
}

</mosaic_0001>

<bundles_post_ra>
// kernel: _forward_packed.1
= control target key start
LH: loop header
LB: loop body
LE: loop exit
PB: predicated region body
PF: predicated region fallthrough
CT: control target
= control target key end

     0   :  { %10 = vsyncpa [#allocation3], 0  ;;  %s375_s0 = inlined_call_operand.vmem [shape: f32[8,32], index: 0, kind: input, shape index: {}]   ;;  %s376_s1 = inlined_call_operand.hbm [shape: f32[32,320], index: 1, kind: input, shape index: {}]   ;;  %s377_s2 = inlined_call_operand.vmem [shape: f32[1,320], index: 2, kind: input, shape index: {}]   ;;  %s378_s3 = inlined_call_operand.hbm [shape: f32[320,128], index: 3, kind: input, shape index: {}]   ;;  %s379_s4 = inlined_call_operand.vmem [shape: f32[1,128], index: 4, kind: input, shape index: {}]   ;;  %s380_s5 = inlined_call_operand.vmem [shape: f32[8,128], index: 5, kind: output, shape index: {}]  }
   0x1   :  { %s18_s20 = sshll.u32 %s376_s1, 4  ;;  %s19_s20 = int_to_ptr.hbm [resolvable:$true] %s18_s20 }
   0x2   :  { %11 = vsyncpa [#allocation5], 0  ;;  %s318_s21 = smov [#allocation2]   ;;  %s33_s25 = sshll.u32 %s378_s3, 4  ;;  %s34_s25 = int_to_ptr.hbm [resolvable:$true] %s33_s25 }
   0x3   :  { %s20_s22 = sshll.u32 %s318_s21, 4  ;;  %s319_s26 = smov 384   ;;  %s21_s22 = int_to_ptr.vmem [resolvable:$true] %s20_s22 }
   0x4   :  { %s320_s27 = smov 24   ;;  %s321_s28 = smov [#allocation4]  }
   0x5   :  { %26 = dma.hbm_to_vmem [thread:$0]  %s19_s20, 1536, %s21_s22, [#allocation3], %s319_s26, %s319_s26, %s320_s27  }
   0x6   :  { %s35_s29 = sshll.u32 %s321_s28, 4  ;;  %s322_s30 = smov 128   ;;  %s36_s29 = int_to_ptr.vmem [resolvable:$true] %s35_s29 }
   0x7   :  { %s323_s6 = smov 8  }
   0x8   :  { %41 = dma.hbm_to_vmem [thread:$0]  %s34_s25, 5120, %s36_s29, [#allocation5], %s322_s30, %s322_s30, %s323_s6  }
   0x9   :  { %314 = dma.done.wait [#allocation3], 1536  }
   0xa   :  { %315 = vsyncadd [#allocation3], 4294965760 }
   0xb   :  { %316 = dma.done.wait [#allocation5], 5120  }
   0xc   :  { %317 = vsyncadd [#allocation5], 4294962176  ;;  %v62_v0 = vld [vmem:[#allocation2 + $0x48] sm:$0xff]  ;;  %v59_v1 = vld [vmem:[#allocation2 + $0x30] sm:$0xff]  ;;  %vm73_vm0 = vcmask 261120   ;;  %vm184_vm1 = vcmask 523264  }
   0xd   :  { %89 = vmatpush.msra.mxu2 %v62_v0  ;;  %v56_v2 = vld [vmem:[#allocation2 + $0x18] sm:$0xff]  ;;  %v63_v3 = vld [vmem:[#allocation2 + $0x50] sm:$0xff]  ;;  %v53_v5 = vld [vmem:[#allocation2] sm:$0xff] }
   0xe   :  { %109 = vmatpush.msra.mxu1 %v63_v3  ;;  %v60_v4 = vld [vmem:[#allocation2 + $0x38] sm:$0xff]  ;;  %v57_v6 = vld [vmem:[#allocation2 + $0x20] sm:$0xff]  ;;  %v154_v9 = vld [vmem:[#allocation4 + $0x70] sm:$0xff] }
   0xf   :  { %90 = vmatpush.msra.mxu2 %v59_v1  ;;  %v155_v7 = vld [vmem:[#allocation4 + $0x78] sm:$0xff]  ;;  %v52_v8 = vld [vmem:[%s375_s0] sm:$0xff]  ;;  %v54_v11 = vld [vmem:[#allocation2 + $0x8] sm:$0xff] }
  0x10   :  { %110 = vmatpush.msra.mxu1 %v60_v4  ;;  %v64_v10 = vld [vmem:[#allocation2 + $0x58] sm:$0xff]  ;;  %188 = vmatpush.msra.mxu3 %v155_v7  ;;  %v153_v12 = vld [vmem:[#allocation4 + $0x68] sm:$0xff]  ;;  %v61_v13 = vld [vmem:[#allocation2 + $0x40] sm:$0xff] }
  0x11   :  { %91 = vmatpush.msra.mxu2 %v56_v2  ;;  %v171_v14 = vld [vmem:[#allocation4 + $0xf8] sm:$0xff]  ;;  %v152_v15 = vld [vmem:[#allocation4 + $0x60] sm:$0xff]  ;;  %v58_v16 = vld [vmem:[#allocation2 + $0x28] sm:$0xff] }
  0x12   :  { %111 = vmatpush.msra.mxu1 %v57_v6  ;;  %189 = vmatpush.msra.mxu3 %v154_v9  ;;  %v170_v17 = vld [vmem:[#allocation4 + $0xf0] sm:$0xff]  ;;  %v151_v18 = vld [vmem:[#allocation4 + $0x58] sm:$0xff]  ;;  %v169_v20 = vld [vmem:[#allocation4 + $0xe8] sm:$0xff] }
  0x13   :  { %92 = vmatpush.msra.mxu2 %v53_v5  ;;  %208 = vmatpush.msra.mxu0 %v171_v14  ;;  %v55_v19 = vld [vmem:[#allocation2 + $0x10] sm:$0xff]  ;;  %v168_v22 = vld [vmem:[#allocation4 + $0xe0] sm:$0xff]  ;;  %v149_v23 = vld [vmem:[#allocation4 + $0x48] sm:$0xff] }
  0x14   :  { %255 = vmatmul.msk.f32.vlgmr.msra.gmra.mxu2 %vm73_vm0, %v52_v8  ;;  %112 = vmatpush.msra.mxu1 %v54_v11  ;;  %v150_v21 = vld [vmem:[#allocation4 + $0x50] sm:$0xff]  ;;  %v167_v24 = vld [vmem:[#allocation4 + $0xd8] sm:$0xff]  ;;  %v148_v25 = vld [vmem:[#allocation4 + $0x40] sm:$0xff] }
  0x15   :  { %129 = vmatpush.msrb.mxu2 %v64_v10  ;;  %256 = vmatmul.msk.f32.vlgmr.msra.gmra.mxu1 %vm73_vm0, %v52_v8  ;;  %v166_v26 = vld [vmem:[#allocation4 + $0xd0] sm:$0xff]  ;;  %v147_v27 = vld [vmem:[#allocation4 + $0x38] sm:$0xff]  ;;  %v165_v28 = vld [vmem:[#allocation4 + $0xc8] sm:$0xff] }
  0x16   :  { %190 = vmatpush.msra.mxu3 %v153_v12  ;;  %209 = vmatpush.msra.mxu0 %v170_v17  ;;  %v146_v29 = vld [vmem:[#allocation4 + $0x30] sm:$0xff]  ;;  %v164_v30 = vld [vmem:[#allocation4 + $0xc0] sm:$0xff]  ;;  %v145_v31 = vld [vmem:[#allocation4 + $0x28] sm:$0xff] }
  0x17   :  { %130 = vmatpush.msrb.mxu2 %v61_v13  ;;  %v163_v32 = vld [vmem:[#allocation4 + $0xb8] sm:$0xff]  ;;  %v144_v33 = vld [vmem:[#allocation4 + $0x20] sm:$0xff]  ;;  %v142_v35 = vld [vmem:[#allocation4 + $0x10] sm:$0xff] }
  0x18   :  { %191 = vmatpush.msra.mxu3 %v152_v15  ;;  %210 = vmatpush.msra.mxu0 %v169_v20  ;;  %v143_v34 = vld [vmem:[#allocation4 + $0x18] sm:$0xff]  ;;  %v162_v36 = vld [vmem:[#allocation4 + $0xb0] sm:$0xff]  ;;  %v141_v38 = vld [vmem:[#allocation4 + $0x8] sm:$0xff] }
  0x19   :  { %131 = vmatpush.msrb.mxu2 %v58_v16  ;;  %v179_v37 = vld [vmem:[#allocation4 + $0x138] sm:$0xff]  ;;  %v161_v39 = vld [vmem:[#allocation4 + $0xa8] sm:$0xff]  ;;  %v178_v40 = vld [vmem:[#allocation4 + $0x130] sm:$0xff] }
  0x1a   :  { %192 = vmatpush.msra.mxu3 %v151_v18  ;;  %211 = vmatpush.msra.mxu0 %v168_v22  ;;  %v140_v41 = vld [vmem:[#allocation4] sm:$0xff]  ;;  %v177_v43 = vld [vmem:[#allocation4 + $0x128] sm:$0xff]  ;;  %v159_v44 = vld [vmem:[#allocation4 + $0x98] sm:$0xff] }
  0x1b   :  { %132 = vmatpush.msrb.mxu2 %v55_v19  ;;  %236 = vmatpush.msrb.mxu1 %v179_v37  ;;  %v160_v42 = vld [vmem:[#allocation4 + $0xa0] sm:$0xff]  ;;  %v158_v46 = vld [vmem:[#allocation4 + $0x90] sm:$0xff]  ;;  %v175_v47 = vld [vmem:[#allocation4 + $0x118] sm:$0xff] }
  0x1c   :  { %257 = vmatmul.msk.f32.vlgmr.msrb.gmra.mxu2 %vm73_vm0, %v52_v8  ;;  %193 = vmatpush.msra.mxu3 %v150_v21  ;;  %v176_v45 = vld [vmem:[#allocation4 + $0x120] sm:$0xff]  ;;  %v157_v48 = vld [vmem:[#allocation4 + $0x88] sm:$0xff]  ;;  %v174_v49 = vld [vmem:[#allocation4 + $0x110] sm:$0xff] }
  0x1d   :  { %212 = vmatpush.msra.mxu0 %v167_v24  ;;  %237 = vmatpush.msrb.mxu1 %v178_v40  ;;  %v156_v50 = vld [vmem:[#allocation4 + $0x80] sm:$0xff]  ;;  %v173_v51 = vld [vmem:[#allocation4 + $0x108] sm:$0xff] }
  0x1e   :  { %194 = vmatpush.msra.mxu3 %v149_v23  ;;  %v172_v52 = vld [vmem:[#allocation4 + $0x100] sm:$0xff] }
  0x1f   :  { %213 = vmatpush.msra.mxu0 %v166_v26  ;;  %238 = vmatpush.msrb.mxu1 %v177_v43  ;;  %v65_v53 = vld [vmem:[%s377_s2] sm:$0x7] }
  0x20   :  { %195 = vmatpush.msra.mxu3 %v148_v25  ;;  %v68_v54 = vperm.slane %v65_v53, 1  ;;  %v67_v56 = vperm.slane %v65_v53, 0  ;;  %v69_v62 = vperm.slane %v65_v53, 2  ;;  %v265_v2 = vld [vmem:[%s379_s4] ss:$0 sm:$0xff] }
  0x21   :  { %214 = vmatpush.msra.mxu0 %v165_v28  ;;  %239 = vmatpush.msrb.mxu1 %v176_v45 }
  0x22   :  { %196 = vmatpush.msra.mxu3 %v147_v27 }
  0x23   :  { %215 = vmatpush.msra.mxu0 %v164_v30  ;;  %240 = vmatpush.msrb.mxu1 %v175_v47 }
  0x24   :  { %197 = vmatpush.msra.mxu3 %v146_v29 }
  0x25   :  { %216 = vmatpush.msra.mxu0 %v163_v32  ;;  %241 = vmatpush.msrb.mxu1 %v174_v49 }
  0x26   :  { %198 = vmatpush.msra.mxu3 %v145_v31 }
  0x27   :  { %217 = vmatpush.msra.mxu0 %v162_v36  ;;  %242 = vmatpush.msrb.mxu1 %v173_v51 }
  0x28   :  { %199 = vmatpush.msra.mxu3 %v144_v33 }
  0x29   :  { %218 = vmatpush.msra.mxu0 %v161_v39  ;;  %243 = vmatpush.msrb.mxu1 %v172_v52 }
  0x2a   :  { %200 = vmatpush.msra.mxu3 %v143_v34 }
  0x2b   :  { %219 = vmatpush.msra.mxu0 %v160_v42 }
  0x2c   :  { %201 = vmatpush.msra.mxu3 %v142_v35 }
  0x2d   :  { %220 = vmatpush.msra.mxu0 %v159_v44 }
  0x2e   :  { %202 = vmatpush.msra.mxu3 %v141_v38 }
  0x2f   :  { %221 = vmatpush.msra.mxu0 %v158_v46 }
  0x30   :  { %203 = vmatpush.msra.mxu3 %v140_v41 }
  0x31   :  { %222 = vmatpush.msra.mxu0 %v157_v48 }
  0x33   :  { %223 = vmatpush.msra.mxu0 %v156_v50 }
  0x92   :  { %v114_v55 = vpop.f32.mrf.mxu1 }
  0x93   :  { %v115_v57 = vadd.f32 %v114_v55, %v68_v54 }
  0x95   :  { %v138_v58 = vmax.f32 %v115_v57, 0.0 }
  0x97   :  { %v94_v59 = vpop.f32.mrf.mxu2  ;;  %224 = vmatmul.f32.vlgmr.msra.gmra.mxu0 %v138_v58 }
  0x98   :  { %v95_v60 = vadd.f32 %v94_v59, %v67_v56 }
  0x9a   :  { %v137_v61 = vmax.f32 %v95_v60, 0.0 }
  0x9c   :  { %204 = vmatmul.f32.vlgmr.msra.gmra.mxu3 %v137_v61 }
  0x9f   :  { %v134_v63 = vpop.f32.mrf.mxu2 }
  0xa0   :  { %v135_v0 = vadd.f32 %v134_v63, %v69_v62 }
  0xa2   :  { %v139_v1 = vmax.f32 %v135_v0, 0.0 }
  0xa4   :  { %258 = vmatmul.msk.f32.vlgmr.msrb.gmra.mxu1 %vm184_vm1, %v139_v1 }
 0x114   :  { %v225_v4 = vpop.f32.mrf.mxu0 }
 0x11f   :  { %v205_v3 = vpop.f32.mrf.mxu3 }
 0x120   :  { %v206_v5 = vadd.f32 %v265_v2, %v205_v3 }
 0x121   :  { %v245_v6 = vpop.f32.mrf.mxu1 }
 0x122   :  { %v226_v7 = vadd.f32 %v225_v4, %v206_v5 }
 0x124   :  { %v246_v8 = vadd.f32 %v245_v6, %v226_v7 }
 0x126   :  { %248 = vst [vmem:[%s380_s5] sm:$0xff] %v246_v8 }
 0x127   :  { %253 = vsyncpa [#allocation3], 1 }
 0x128   :  { %254 = vsyncpa [#allocation5], 1 }

</bundles_post_ra>
